<compile_context>
chip_gen: v7x
topology: tpu7x:2x2x1
jax: 0.10.0
libtpu: 0.0.40
codegen_flags: <defaults>
</compile_context>

<pallas_src>
import jax
import jax.numpy as jnp
from jax import lax
from jax.experimental import pallas as pl
from jax.experimental.pallas import tpu as pltpu

# ---- small shapes consistent with the module ----
B = 2            # batch
N = 8            # sequence length (domain points)
DIM = 32         # model dim
HEADS = 4
DIM_HEAD = 16
INNER = HEADS * DIM_HEAD        # 64
LANES = B * INNER               # 128: both batches merged into one lane slab
EPS = 1e-5                      # nn.InstanceNorm1d default eps
OUT_W = 128                     # projection width inside kernel (batch0 cols 0:32, batch1 cols 64:96)


def linear_attention_kernel(x_ref, wqkv_ref, mavg_ref, mdots_ref, wout_ref, bout_ref, o_ref):
    """Whole problem in one invocation (everything VMEM-resident, < 0.5 MB).

    x_ref     : (B, N, DIM)          activations
    wqkv_ref  : (B, DIM, 3*LANES)    block-diagonal qkv weight; batch b writes lanes [b*64,(b+1)*64)
                                      of each 128-lane chunk [q | k | v]
    mavg_ref  : (LANES, LANES)       per-(batch,head) segmented-mean operator (1/dim_head blocks)
    mdots_ref : (LANES, LANES)       same-(batch,head) block mask with the 1/n scale folded in
    wout_ref  : (LANES, OUT_W)       to_out weight; batch0 rows -> cols [0:DIM), batch1 -> [64:64+DIM)
    bout_ref  : (1, DIM)             to_out bias
    o_ref     : (B, N, DIM)          output, exact module layout (no post-call ops needed)
    """
    # qkv projection for both batches and all of q/k/v: two small matmuls summed
    # (avoids a minor-dim concat of x; the block-diagonal weights keep batches in
    # disjoint lane blocks so the sum is exact).
    qkv = (jnp.dot(x_ref[0], wqkv_ref[0], preferred_element_type=jnp.float32) +
           jnp.dot(x_ref[1], wqkv_ref[1], preferred_element_type=jnp.float32))   # (N, 3*LANES)

    q = qkv[:, 0 * LANES:1 * LANES]                                              # (N, 128)
    k = qkv[:, 1 * LANES:2 * LANES]
    v = qkv[:, 2 * LANES:3 * LANES]

    # InstanceNorm over dim_head, per (batch, head, position): all four statistics
    # (mean_k, E[k^2], mean_v, E[v^2]) in ONE matmul via a sublane row-stack.
    stats_in = jnp.concatenate([k, k * k, v, v * v], axis=0)                     # (4N, 128)
    stats = jnp.dot(stats_in, mavg_ref[...], preferred_element_type=jnp.float32)
    mean_k, ex2_k = stats[0:N], stats[N:2 * N]
    mean_v, ex2_v = stats[2 * N:3 * N], stats[3 * N:4 * N]

    var_k = jnp.maximum(ex2_k - mean_k * mean_k, 0.0)   # clamp f32 cancellation
    var_v = jnp.maximum(ex2_v - mean_v * mean_v, 0.0)
    k = (k - mean_k) * lax.rsqrt(var_k + EPS)           # rsqrt -> EUP slot
    v = (v - mean_v) * lax.rsqrt(var_v + EPS)

    # k^T v for all heads and both batches in one 128x128 dot; cross-head / cross-batch
    # blocks are garbage and get masked (1/n folded into the mask).
    dots = lax.dot_general(k, v, (((0,), (0,)), ((), ())),
                           preferred_element_type=jnp.float32)                   # (128, 128)
    out_m = jnp.dot(q, dots * mdots_ref[...], preferred_element_type=jnp.float32)  # (N, 128)

    # Output projection: per-batch column blocks baked into the prepped weight.
    proj = jnp.dot(out_m, wout_ref[...], preferred_element_type=jnp.float32)     # (N, OUT_W)
    bias = bout_ref[...]                                                         # (1, DIM)
    o_ref[0] = proj[:, 0:DIM] + bias
    o_ref[1] = proj[:, INNER:INNER + DIM] + bias


def prepare_params(w_qkv, w_out, b_out):
    """One-time parameter preparation — hoisted out of the per-call forward path."""
    w_q, w_k, w_v = jnp.split(w_qkv, 3, axis=-1)                     # (DIM, INNER) each

    # Per-batch block-diagonal qkv weight: batch b maps into lanes [b*64,(b+1)*64) of
    # each 128-lane chunk [q | k | v].
    w_qkv_b = jnp.zeros((B, DIM, 3 * LANES), jnp.float32)
    for c, w in enumerate((w_q, w_k, w_v)):
        for b in range(B):
            lo = c * LANES + b * INNER
            w_qkv_b = w_qkv_b.at[b, :, lo:lo + INNER].set(w)

    # Block-diagonal (batch, head) operators over the merged 128-lane axis.
    blk = jnp.arange(LANES) // DIM_HEAD
    same = (blk[:, None] == blk[None, :]).astype(jnp.float32)        # (128, 128)
    m_avg = same / DIM_HEAD                                          # segmented mean
    m_dots = same / N                                                # head mask + 1/n scale

    # Output projection: batch0 rows -> cols [0:DIM), batch1 rows -> cols [INNER:INNER+DIM).
    w_out_m = jnp.zeros((LANES, OUT_W), jnp.float32)
    w_out_m = w_out_m.at[0:INNER, 0:DIM].set(w_out)
    w_out_m = w_out_m.at[INNER:LANES, INNER:INNER + DIM].set(w_out)
    b_out_m = b_out.reshape(1, DIM).astype(jnp.float32)

    return w_qkv_b, m_avg, m_dots, w_out_m, b_out_m


def linear_attention(x, params):
    """Forward path: exactly one pallas_call, no pre/post XLA ops."""
    w_qkv_b, m_avg, m_dots, w_out_m, b_out_m = params
    vmem = pltpu.MemorySpace.VMEM
    return pl.pallas_call(
        linear_attention_kernel,
        out_shape=jax.ShapeDtypeStruct((B, N, DIM), jnp.float32),
        in_specs=[pl.BlockSpec(memory_space=vmem) for _ in range(6)],
        out_specs=pl.BlockSpec(memory_space=vmem),
    )(x, w_qkv_b, m_avg, m_dots, w_out_m, b_out_m)


def reference_linear_attention(x, w_qkv, w_out, b_out):
    """Pure-JAX transcription of LinearAttention.forward (galerkin, defaults)."""
    qkv = x @ w_qkv
    q, k, v = jnp.split(qkv, 3, axis=-1)

    def split_heads(t):
        return t.reshape(B, N, HEADS, DIM_HEAD).transpose(0, 2, 1, 3)   # (B,H,N,D)

    q, k, v = map(split_heads, (q, k, v))

    def inst_norm(t):   # InstanceNorm1d applied to (b h) n d: normalize last dim
        mean = t.mean(axis=-1, keepdims=True)
        var = t.var(axis=-1, keepdims=True)                # biased variance
        return (t - mean) / jnp.sqrt(var + EPS)

    k = inst_norm(k)
    v = inst_norm(v)
    dots = jnp.einsum('bhnd,bhne->bhde', k, v)             # k^T v
    out = jnp.einsum('bhnd,bhde->bhne', q, dots) * (1.0 / N)
    out = out.transpose(0, 2, 1, 3).reshape(B, N, INNER)   # 'b h n d -> b n (h d)'
    return out @ w_out + b_out


if __name__ == "__main__":
    key = jax.random.PRNGKey(0)
    kx, kqkv, kwo, kbo = jax.random.split(key, 4)

    x = jax.random.normal(kx, (B, N, DIM), dtype=jnp.float32)
    w_qkv = jax.random.normal(kqkv, (DIM, 3 * INNER), dtype=jnp.float32) * (DIM ** -0.5)
    w_out = jax.random.normal(kwo, (INNER, DIM), dtype=jnp.float32) * (INNER ** -0.5)
    b_out = jax.random.normal(kbo, (DIM,), dtype=jnp.float32) * 0.01

    # Parameter prep runs once (init time), not per forward call.
    params = jax.block_until_ready(prepare_params(w_qkv, w_out, b_out))

    out = jax.block_until_ready(linear_attention(x, params))

    ref = reference_linear_attention(x, w_qkv, w_out, b_out)
    assert out.shape == (B, N, DIM)
    assert jnp.allclose(out, ref, atol=1e-3, rtol=1e-3), "mismatch vs reference"

    print("KERNEL_OK")
</pallas_src>

<mosaic_0001>
module attributes {stable_mosaic.version = 11 : i64} {
  func.func @linear_attention_kernel(%arg0: memref<2x8x32xf32, #tpu.memory_space<vmem>>, %arg1: memref<2x32x384xf32, #tpu.memory_space<vmem>>, %arg2: memref<128x128xf32, #tpu.memory_space<vmem>>, %arg3: memref<128x128xf32, #tpu.memory_space<vmem>>, %arg4: memref<128x128xf32, #tpu.memory_space<vmem>>, %arg5: memref<1x32xf32, #tpu.memory_space<vmem>>, %arg6: memref<2x8x32xf32, #tpu.memory_space<vmem>>) attributes {dimension_semantics = [], scalar_prefetch = 0 : i64, scratch_operands = 0 : i64, tpu.core_type = #tpu.core_type<tc>} {
    %c0 = arith.constant 0 : index
    %c0_0 = arith.constant 0 : index
    %c0_1 = arith.constant 0 : index
    %0 = vector.load %arg0[%c0, %c0_0, %c0_1] : memref<2x8x32xf32, #tpu.memory_space<vmem>>, vector<1x8x32xf32>
    %1 = vector.shape_cast %0 : vector<1x8x32xf32> to vector<8x32xf32>
    %c0_2 = arith.constant 0 : index
    %c0_3 = arith.constant 0 : index
    %c0_4 = arith.constant 0 : index
    %2 = vector.load %arg1[%c0_2, %c0_3, %c0_4] : memref<2x32x384xf32, #tpu.memory_space<vmem>>, vector<1x32x384xf32>
    %3 = vector.shape_cast %2 : vector<1x32x384xf32> to vector<32x384xf32>
    %cst = arith.constant dense<0.000000e+00> : vector<8x384xf32>
    %4 = tpu.matmul %1, %3, %cst {dimension_numbers = #tpu.dot_dimension_numbers<[1], [0], [0], [1], [0, 0, 1, 1], [], []>} : vector<8x32xf32>, vector<32x384xf32>, vector<8x384xf32> -> vector<8x384xf32>
    %c1 = arith.constant 1 : index
    %c0_5 = arith.constant 0 : index
    %c0_6 = arith.constant 0 : index
    %5 = vector.load %arg0[%c1, %c0_5, %c0_6] : memref<2x8x32xf32, #tpu.memory_space<vmem>>, vector<1x8x32xf32>
    %6 = vector.shape_cast %5 : vector<1x8x32xf32> to vector<8x32xf32>
    %c1_7 = arith.constant 1 : index
    %c0_8 = arith.constant 0 : index
    %c0_9 = arith.constant 0 : index
    %7 = vector.load %arg1[%c1_7, %c0_8, %c0_9] : memref<2x32x384xf32, #tpu.memory_space<vmem>>, vector<1x32x384xf32>
    %8 = vector.shape_cast %7 : vector<1x32x384xf32> to vector<32x384xf32>
    %cst_10 = arith.constant dense<0.000000e+00> : vector<8x384xf32>
    %9 = tpu.matmul %6, %8, %cst_10 {dimension_numbers = #tpu.dot_dimension_numbers<[1], [0], [0], [1], [0, 0, 1, 1], [], []>} : vector<8x32xf32>, vector<32x384xf32>, vector<8x384xf32> -> vector<8x384xf32>
    %10 = arith.addf %4, %9 : vector<8x384xf32>
    %11 = vector.extract_strided_slice %10 {offsets = [0, 0], sizes = [8, 128], strides = [1, 1]} : vector<8x384xf32> to vector<8x128xf32>
    %12 = vector.extract_strided_slice %10 {offsets = [0, 128], sizes = [8, 128], strides = [1, 1]} : vector<8x384xf32> to vector<8x128xf32>
    %13 = vector.extract_strided_slice %10 {offsets = [0, 256], sizes = [8, 128], strides = [1, 1]} : vector<8x384xf32> to vector<8x128xf32>
    %14 = arith.mulf %12, %12 : vector<8x128xf32>
    %15 = arith.mulf %13, %13 : vector<8x128xf32>
    %16 = tpu.concatenate %12, %14, %13, %15 in 0 : vector<8x128xf32>, vector<8x128xf32>, vector<8x128xf32>, vector<8x128xf32> -> vector<32x128xf32>
    %c0_11 = arith.constant 0 : index
    %c0_12 = arith.constant 0 : index
    %17 = vector.load %arg2[%c0_11, %c0_12] : memref<128x128xf32, #tpu.memory_space<vmem>>, vector<128x128xf32>
    %cst_13 = arith.constant dense<0.000000e+00> : vector<32x128xf32>
    %18 = tpu.matmul %16, %17, %cst_13 {dimension_numbers = #tpu.dot_dimension_numbers<[1], [0], [0], [1], [0, 0, 1, 1], [], []>} : vector<32x128xf32>, vector<128x128xf32>, vector<32x128xf32> -> vector<32x128xf32>
    %19 = vector.extract_strided_slice %18 {offsets = [0, 0], sizes = [8, 128], strides = [1, 1]} : vector<32x128xf32> to vector<8x128xf32>
    %20 = vector.extract_strided_slice %18 {offsets = [8, 0], sizes = [8, 128], strides = [1, 1]} : vector<32x128xf32> to vector<8x128xf32>
    %21 = vector.extract_strided_slice %18 {offsets = [16, 0], sizes = [8, 128], strides = [1, 1]} : vector<32x128xf32> to vector<8x128xf32>
    %22 = vector.extract_strided_slice %18 {offsets = [24, 0], sizes = [8, 128], strides = [1, 1]} : vector<32x128xf32> to vector<8x128xf32>
    %23 = arith.mulf %19, %19 : vector<8x128xf32>
    %24 = arith.subf %20, %23 : vector<8x128xf32>
    %cst_14 = arith.constant 0.000000e+00 : f32
    %25 = vector.broadcast %cst_14 : f32 to vector<8x128xf32>
    %26 = arith.maximumf %24, %25 : vector<8x128xf32>
    %27 = arith.mulf %21, %21 : vector<8x128xf32>
    %28 = arith.subf %22, %27 : vector<8x128xf32>
    %cst_15 = arith.constant 0.000000e+00 : f32
    %29 = vector.broadcast %cst_15 : f32 to vector<8x128xf32>
    %30 = arith.maximumf %28, %29 : vector<8x128xf32>
    %31 = arith.subf %12, %19 : vector<8x128xf32>
    %cst_16 = arith.constant 9.99999974E-6 : f32
    %32 = vector.broadcast %cst_16 : f32 to vector<8x128xf32>
    %33 = arith.addf %26, %32 : vector<8x128xf32>
    %34 = math.rsqrt %33 : vector<8x128xf32>
    %35 = arith.mulf %31, %34 : vector<8x128xf32>
    %36 = arith.subf %13, %21 : vector<8x128xf32>
    %cst_17 = arith.constant 9.99999974E-6 : f32
    %37 = vector.broadcast %cst_17 : f32 to vector<8x128xf32>
    %38 = arith.addf %30, %37 : vector<8x128xf32>
    %39 = math.rsqrt %38 : vector<8x128xf32>
    %40 = arith.mulf %36, %39 : vector<8x128xf32>
    %cst_18 = arith.constant dense<0.000000e+00> : vector<128x128xf32>
    %41 = tpu.matmul %35, %40, %cst_18 {dimension_numbers = #tpu.dot_dimension_numbers<[0], [0], [1], [1], [0, 1, 1, 1], [], []>} : vector<8x128xf32>, vector<8x128xf32>, vector<128x128xf32> -> vector<128x128xf32>
    %c0_19 = arith.constant 0 : index
    %c0_20 = arith.constant 0 : index
    %42 = vector.load %arg3[%c0_19, %c0_20] : memref<128x128xf32, #tpu.memory_space<vmem>>, vector<128x128xf32>
    %43 = arith.mulf %41, %42 : vector<128x128xf32>
    %cst_21 = arith.constant dense<0.000000e+00> : vector<8x128xf32>
    %44 = tpu.matmul %11, %43, %cst_21 {dimension_numbers = #tpu.dot_dimension_numbers<[1], [0], [0], [1], [0, 0, 1, 1], [], []>} : vector<8x128xf32>, vector<128x128xf32>, vector<8x128xf32> -> vector<8x128xf32>
    %c0_22 = arith.constant 0 : index
    %c0_23 = arith.constant 0 : index
    %45 = vector.load %arg4[%c0_22, %c0_23] : memref<128x128xf32, #tpu.memory_space<vmem>>, vector<128x128xf32>
    %cst_24 = arith.constant dense<0.000000e+00> : vector<8x128xf32>
    %46 = tpu.matmul %44, %45, %cst_24 {dimension_numbers = #tpu.dot_dimension_numbers<[1], [0], [0], [1], [0, 0, 1, 1], [], []>} : vector<8x128xf32>, vector<128x128xf32>, vector<8x128xf32> -> vector<8x128xf32>
    %c0_25 = arith.constant 0 : index
    %c0_26 = arith.constant 0 : index
    %47 = vector.load %arg5[%c0_25, %c0_26] : memref<1x32xf32, #tpu.memory_space<vmem>>, vector<1x32xf32>
    %48 = vector.extract_strided_slice %46 {offsets = [0, 0], sizes = [8, 32], strides = [1, 1]} : vector<8x128xf32> to vector<8x32xf32>
    %49 = vector.broadcast %47 : vector<1x32xf32> to vector<8x32xf32>
    %50 = arith.addf %48, %49 : vector<8x32xf32>
    %c0_27 = arith.constant 0 : index
    %c0_28 = arith.constant 0 : index
    %c0_29 = arith.constant 0 : index
    %51 = vector.load %arg6[%c0_27, %c0_28, %c0_29] : memref<2x8x32xf32, #tpu.memory_space<vmem>>, vector<1x8x32xf32>
    %52 = vector.shape_cast %51 : vector<1x8x32xf32> to vector<8x32xf32>
    %53 = vector.shape_cast %50 : vector<8x32xf32> to vector<1x8x32xf32>
    tpu.vector_store %arg6[%c0_27, %c0_28, %c0_29], %53 {strides = array<i32>} : memref<2x8x32xf32, #tpu.memory_space<vmem>>, vector<1x8x32xf32>,
    %54 = vector.extract_strided_slice %46 {offsets = [0, 64], sizes = [8, 32], strides = [1, 1]} : vector<8x128xf32> to vector<8x32xf32>
    %55 = vector.broadcast %47 : vector<1x32xf32> to vector<8x32xf32>
    %56 = arith.addf %54, %55 : vector<8x32xf32>
    %c1_30 = arith.constant 1 : index
    %c0_31 = arith.constant 0 : index
    %c0_32 = arith.constant 0 : index
    %57 = vector.load %arg6[%c1_30, %c0_31, %c0_32] : memref<2x8x32xf32, #tpu.memory_space<vmem>>, vector<1x8x32xf32>
    %58 = vector.shape_cast %57 : vector<1x8x32xf32> to vector<8x32xf32>
    %59 = vector.shape_cast %56 : vector<8x32xf32> to vector<1x8x32xf32>
    tpu.vector_store %arg6[%c1_30, %c0_31, %c0_32], %59 {strides = array<i32>} : memref<2x8x32xf32, #tpu.memory_space<vmem>>, vector<1x8x32xf32>,
    return
  }
}

</mosaic_0001>

<bundles_post_ra>
// kernel: tpu_custom_call.1
= control target key start
LH: loop header
LB: loop body
LE: loop exit
PB: predicated region body
PF: predicated region fallthrough
CT: control target
= control target key end

     0   :  { %11 = vsyncpa [#allocation3], 0  ;;  %s1700_s0 = inlined_call_operand.hbm [shape: f32[2,8,32], index: 0, kind: input, shape index: {}]   ;;  %s1701_s1 = inlined_call_operand.hbm [shape: f32[2,32,384], index: 1, kind: input, shape index: {}]   ;;  %s1702_s2 = inlined_call_operand.hbm [shape: f32[128,128], index: 2, kind: input, shape index: {}]   ;;  %s1703_s3 = inlined_call_operand.hbm [shape: f32[128,128], index: 3, kind: input, shape index: {}]   ;;  %s1704_s4 = inlined_call_operand.hbm [shape: f32[128,128], index: 4, kind: input, shape index: {}]   ;;  %s1705_s5 = inlined_call_operand.vmem [shape: f32[1,32], index: 5, kind: input, shape index: {}]   ;;  %s1706_s6 = inlined_call_operand.hbm [shape: f32[2,8,32], index: 6, kind: output, shape index: {}]  }
   0x1   :  { %12 = vsyncpa [#allocation6], 0 }
   0x2   :  { %13 = vsyncpa [#allocation9], 0 }
   0x3   :  { %14 = vsyncpa [#allocation4], 0  ;;  %s1506_s21 = smov [#allocation5]   ;;  %s1366_s25 = scalar_lea.hbm %s1701_s1, 3072 }
   0x4   :  { %s32_s22 = sshll.u32 %s1506_s21, 4  ;;  %p1367_p0 = scmp.ne.s32.totalorder %s1701_s1, %s1366_s25  ;;  %s33_s22 = int_to_ptr.vmem [resolvable:$true] %s32_s22 }
   0x5   :  { %p1370_p1 = scmp.lt.u32.totalorder %s1366_s25, %s1701_s1 }
   0x7   :  { %p1372_p2 = pnand %p1370_p1, %p1367_p0 }
   0x9   :  { %1375 = shalt.err (!%p1372_p2)
}
   0xa   :  { %s1376_s30 = scalar_lea.vmem %s33_s22, 3072  ;;  %p1381_p4 = scmp.lt.s32.totalorder %s33_s22, %s33_s22 }
   0xb   :  { %p1377_p3 = scmp.ne.s32.totalorder %s33_s22, %s1376_s30  ;;  %p1382_p5 = scmp.lt.s32.totalorder %s1376_s30, %s1376_s30 }
   0xd   :  { %p1383_p6 = por %p1382_p5, %p1381_p4 }
   0xf   :  { %p1384_p7 = pnand %p1383_p6, %p1377_p3 }
  0x11   :  { %1387 = shalt.err (!%p1384_p7)
}
  0x12   :  { %s1507_s7 = smov 384   ;;  %s1508_s8 = smov 24  }
  0x13   :  { %38 = dma.hbm_to_vmem [thread:$0]  %s1701_s1, 3072, %s33_s22, [#allocation6], %s1507_s7, %s1507_s7, %s1508_s8  }
  0x14   :  { %s1509_s11 = smov [#allocation8]   ;;  %s1510_s13 = smov [#allocation2]  }
  0x15   :  { %s56_s12 = sshll.u32 %s1509_s11, 4  ;;  %s20_s14 = sshll.u32 %s1510_s13, 4  ;;  %s57_s12 = int_to_ptr.vmem [resolvable:$true] %s56_s12  ;;  %s21_s14 = int_to_ptr.vmem [resolvable:$true] %s20_s14 }
  0x16   :  { %s1388_s17 = scalar_lea.hbm %s1703_s3, 2048 }
  0x17   :  { %p1389_p8 = scmp.ne.s32.totalorder %s1703_s3, %s1388_s17  ;;  %p1392_p9 = scmp.lt.u32.totalorder %s1388_s17, %s1703_s3 }
  0x19   :  { %p1394_p10 = pnand %p1392_p9, %p1389_p8 }
  0x1b   :  { %1397 = shalt.err (!%p1394_p10)
}
  0x1c   :  { %s1398_s1 = scalar_lea.vmem %s57_s12, 2048  ;;  %p1403_p12 = scmp.lt.s32.totalorder %s57_s12, %s57_s12 }
  0x1d   :  { %p1399_p11 = scmp.ne.s32.totalorder %s57_s12, %s1398_s1  ;;  %p1404_p13 = scmp.lt.s32.totalorder %s1398_s1, %s1398_s1 }
  0x1f   :  { %p1405_p0 = por %p1404_p13, %p1403_p12 }
  0x21   :  { %p1406_p1 = pnand %p1405_p0, %p1399_p11 }
  0x23   :  { %1409 = shalt.err (!%p1406_p1)
}
  0x24   :  { %s1511_s22 = smov 128   ;;  %s1512_s23 = smov 8  }
  0x25   :  { %62 = dma.hbm_to_vmem [thread:$0]  %s1703_s3, 2048, %s57_s12, [#allocation9], %s1511_s22, %s1511_s22, %s1512_s23  }
  0x26   :  { %s1410_s28 = scalar_lea.hbm %s1700_s0, 256 }
  0x27   :  { %p1411_p2 = scmp.ne.s32.totalorder %s1700_s0, %s1410_s28  ;;  %p1414_p3 = scmp.lt.u32.totalorder %s1410_s28, %s1700_s0 }
  0x29   :  { %p1416_p4 = pnand %p1414_p3, %p1411_p2 }
  0x2b   :  { %1419 = shalt.err (!%p1416_p4)
}
  0x2c   :  { %s1420_s9 = scalar_lea.vmem %s21_s14, 256  ;;  %p1425_p6 = scmp.lt.s32.totalorder %s21_s14, %s21_s14 }
  0x2d   :  { %p1421_p5 = scmp.ne.s32.totalorder %s21_s14, %s1420_s9  ;;  %p1426_p7 = scmp.lt.s32.totalorder %s1420_s9, %s1420_s9 }
  0x2f   :  { %p1427_p8 = por %p1426_p7, %p1425_p6 }
  0x31   :  { %p1428_p9 = pnand %p1427_p8, %p1421_p5 }
  0x33   :  { %1431 = shalt.err (!%p1428_p9)
}
  0x34   :  { %26 = dma.hbm_to_vmem [thread:$0]  %s1700_s0, 256, %s21_s14, [#allocation3], %s1511_s22, %s1511_s22, %s1512_s23  }
  0x35   :  { %s1513_s11 = smov [#allocation7]   ;;  %s1514_s13 = smov [#allocation10]  }
  0x36   :  { %s44_s12 = sshll.u32 %s1513_s11, 4  ;;  %s68_s15 = sshll.u32 %s1514_s13, 4  ;;  %s45_s12 = int_to_ptr.vmem [resolvable:$true] %s44_s12  ;;  %s69_s15 = int_to_ptr.vmem [resolvable:$true] %s68_s15 }
  0x37   :  { %s1432_s18 = scalar_lea.hbm %s1702_s2, 2048 }
  0x38   :  { %p1433_p10 = scmp.ne.s32.totalorder %s1702_s2, %s1432_s18  ;;  %p1436_p11 = scmp.lt.u32.totalorder %s1432_s18, %s1702_s2 }
  0x3a   :  { %p1438_p12 = pnand %p1436_p11, %p1433_p10 }
  0x3c   :  { %1441 = shalt.err (!%p1438_p12)
}
  0x3d   :  { %s1442_s0 = scalar_lea.vmem %s45_s12, 2048  ;;  %p1447_p0 = scmp.lt.s32.totalorder %s45_s12, %s45_s12 }
  0x3e   :  { %p1443_p13 = scmp.ne.s32.totalorder %s45_s12, %s1442_s0  ;;  %p1448_p1 = scmp.lt.s32.totalorder %s1442_s0, %s1442_s0 }
  0x40   :  { %p1449_p2 = por %p1448_p1, %p1447_p0 }
  0x42   :  { %p1450_p3 = pnand %p1449_p2, %p1443_p13 }
  0x44   :  { %1453 = shalt.err (!%p1450_p3)
}
  0x45   :  { %50 = dma.hbm_to_vmem [thread:$0]  %s1702_s2, 2048, %s45_s12, [#allocation6], %s1511_s22, %s1511_s22, %s1512_s23  }
  0x46   :  { %s1454_s27 = scalar_lea.hbm %s1704_s4, 2048 }
  0x47   :  { %p1455_p4 = scmp.ne.s32.totalorder %s1704_s4, %s1454_s27  ;;  %p1458_p5 = scmp.lt.u32.totalorder %s1454_s27, %s1704_s4 }
  0x49   :  { %p1460_p6 = pnand %p1458_p5, %p1455_p4 }
  0x4b   :  { %1463 = shalt.err (!%p1460_p6)
}
  0x4c   :  { %s1464_s8 = scalar_lea.vmem %s69_s15, 2048  ;;  %p1469_p8 = scmp.lt.s32.totalorder %s69_s15, %s69_s15 }
  0x4d   :  { %p1465_p7 = scmp.ne.s32.totalorder %s69_s15, %s1464_s8  ;;  %p1470_p9 = scmp.lt.s32.totalorder %s1464_s8, %s1464_s8 }
  0x4f   :  { %p1471_p10 = por %p1470_p9, %p1469_p8 }
  0x51   :  { %p1472_p11 = pnand %p1471_p10, %p1465_p7 }
  0x53   :  { %1475 = shalt.err (!%p1472_p11)
}
  0x54   :  { %74 = dma.hbm_to_vmem [thread:$0]  %s1704_s4, 2048, %s69_s15, [#allocation9], %s1511_s22, %s1511_s22, %s1512_s23  }
  0x55   :  { %1498 = dma.done.wait [#allocation3], 256  }
  0x56   :  { %1499 = vsyncadd [#allocation3], 4294967040 }
  0x57   :  { %1500 = dma.done.wait [#allocation6], 5120  }
  0x58   :  { %1501 = vsyncadd [#allocation6], 4294962176 }
  0x59   :  { %1502 = dma.done.wait [#allocation9], 4096  }
  0x5a   :  { %1503 = vsyncadd [#allocation9], 4294963200  ;;  %v1515_v0 = vmov 0.0   ;;  %v109_v1 = vld [vmem:[#allocation5 + $0x68] sm:$0xff]  ;;  %v112_v2 = vld [vmem:[#allocation5 + $0x80] sm:$0xff]  ;;  %vm120_vm0 = vcmask 261120  }
  0x5b   :  { %188 = vmatprep.mubr.f32.mxu1 %v1515_v0  ;;  %v108_v3 = vld [vmem:[#allocation5 + $0x60] sm:$0xff]  ;;  %v1236_v4 = vpack.c.bf16 %v112_v2, %v109_v1  ;;  %v111_v5 = vld [vmem:[#allocation5 + $0x78] sm:$0xff]  ;;  %v118_v7 = vld [vmem:[#allocation5 + $0xb0] sm:$0xff]  ;;  %v1516_v20 = vmov 0.0|0.0   ;;  %vm1517_vm1 = vmmov 0   ;;  %vm558_vm2 = vcmask 64512  }
  0x5c   :  { %v115_v6 = vld [vmem:[#allocation5 + $0x98] sm:$0xff]  ;;  %v1238_v8 = vpack.c.bf16 %v111_v5, %v108_v3  ;;  %v114_v10 = vld [vmem:[#allocation5 + $0x90] sm:$0xff]  ;;  %v117_v11 = vld [vmem:[#allocation5 + $0xa8] sm:$0xff]  ;;  %s1518_s10 = smov 64   ;;  %s1519_s11 = smov [#allocation11]  }
  0x5d   :  { %v1240_v9 = vpack.c.bf16 %v118_v7, %v115_v6  ;;  %1237 = vmatprep.subr.bf16.mxu1 %v1236_v4  ;;  %v1242_v12 = vpack.c.bf16 %v117_v11, %v114_v10  ;;  %v110_v13 = vld [vmem:[#allocation5 + $0x70] sm:$0xff]  ;;  %v113_v14 = vld [vmem:[#allocation5 + $0x88] sm:$0xff]  ;;  %v106_v15 = vld [vmem:[#allocation2 + $0x8] sm:$0xff]  ;;  %s964_s12 = sshll.u32 %s1519_s11, 4  ;;  %s965_s12 = int_to_ptr.vmem [resolvable:$true] %s964_s12 }
  0x5e   :  { %1239 = vmatpush1.bf16.msra.mxu1 %v1238_v8  ;;  %v1245_v16 = vpack.c.bf16 %v113_v14, %v110_v13  ;;  %v116_v17 = vld [vmem:[#allocation5 + $0xa0] sm:$0xff]  ;;  %v119_v18 = vld [vmem:[#allocation5 + $0xb8] sm:$0xff]  ;;  %v412_v21 = vld [vmem:[#allocation7 + $0x8] sm:$0xff]  ;;  %p1481_p13 = scmp.lt.s32.totalorder %s965_s12, %s965_s12 }
  0x5f   :  { %1241 = vmatprep.subr.bf16.mxu1 %v1240_v9  ;;  %v411_v19 = vld [vmem:[#allocation7] sm:$0xff]  ;;  %v413_v22 = vld [vmem:[#allocation7 + $0x10] sm:$0xff]  ;;  %v414_v23 = vld [vmem:[#allocation7 + $0x18] sm:$0xff]  ;;  %v1248_v28 = vpack.c.bf16 %v119_v18, %v116_v17 }
  0x60   :  { %v94_v24 = vld [vmem:[#allocation5 + $0x8] sm:$0xff]  ;;  %v97_v25 = vld [vmem:[#allocation5 + $0x20] sm:$0xff]  ;;  %v1264_v26 = vpack.c.bf16 %v412_v21, %v411_v19  ;;  %v1268_v27 = vpack.c.bf16 %v414_v23, %v413_v22  ;;  %v96_v33 = vld [vmem:[#allocation5 + $0x18] sm:$0xff] }
  0x61   :  { %v415_v29 = vld [vmem:[#allocation7 + $0x20] sm:$0xff]  ;;  %v416_v30 = vld [vmem:[#allocation7 + $0x28] sm:$0xff]  ;;  %v1250_v31 = vpack.c.bf16 %v97_v25, %v94_v24  ;;  %v100_v34 = vld [vmem:[#allocation5 + $0x38] sm:$0xff] }
  0x62   :  { %1243 = vmatpush1.bf16.msra.mxu1 %v1242_v12  ;;  %v93_v32 = vld [vmem:[#allocation5] sm:$0xff]  ;;  %1265 = vmatprep.subr.bf16.mxu0 %v1264_v26  ;;  %v103_v35 = vld [vmem:[#allocation5 + $0x50] sm:$0xff]  ;;  %v1272_v36 = vpack.c.bf16 %v416_v30, %v415_v29  ;;  %v418_v39 = vld [vmem:[#allocation7 + $0x38] sm:$0xff] }
  0x63   :  { %1244 = vmatprep.subr.bf16.mxu1 %v1516_v20  ;;  %1267 = vmatpush3.bf16.msra.mxu0 %v1264_v26  ;;  %v1252_v37 = vpack.c.bf16 %v96_v33, %v93_v32  ;;  %v417_v38 = vld [vmem:[#allocation7 + $0x30] sm:$0xff]  ;;  %v1254_v40 = vpack.c.bf16 %v103_v35, %v100_v34  ;;  %v102_v42 = vld [vmem:[#allocation5 + $0x48] sm:$0xff]  ;;  %v419_v45 = vld [vmem:[#allocation7 + $0x40] sm:$0xff] }
  0x64   :  { %1269 = vmatprep.subr.bf16.mxu0 %v1268_v27  ;;  %v99_v41 = vld [vmem:[#allocation5 + $0x30] sm:$0xff]  ;;  %v1276_v43 = vpack.c.bf16 %v418_v39, %v417_v38  ;;  %v420_v46 = vld [vmem:[#allocation7 + $0x48] sm:$0xff]  ;;  %v422_v53 = vld [vmem:[#allocation7 + $0x58] sm:$0xff] }
  0x65   :  { %978 = vmatmul.mubr.msk.f32.vlgmr.msra.gmra.mrb[0].mxu1 %vm120_vm0, %v106_v15  ;;  %v1256_v44 = vpack.c.bf16 %v102_v42, %v99_v41  ;;  %v95_v47 = vld [vmem:[#allocation5 + $0x10] sm:$0xff]  ;;  %v98_v48 = vld [vmem:[#allocation5 + $0x28] sm:$0xff]  ;;  %v1280_v49 = vpack.c.bf16 %v420_v46, %v419_v45  ;;  %v101_v54 = vld [vmem:[#allocation5 + $0x40] sm:$0xff] }
  0x66   :  { %1246 = vmatpush3.bf16.msra.mxu1 %v1245_v16  ;;  %1088 = vmatprep.mubr.msk.f32.mxu1 %vm1517_vm1, %v1515_v0  ;;  %v92_v50 = vld [vmem:[#allocation2] sm:$0xff]  ;;  %v1259_v51 = vpack.c.bf16 %v98_v48, %v95_v47  ;;  %v104_v55 = vld [vmem:[#allocation5 + $0x58] sm:$0xff]  ;;  %v423_v58 = vld [vmem:[#allocation7 + $0x60] sm:$0xff] }
  0x67   :  { %1247 = vmatprep.subr.bf16.mxu1 %v1516_v20  ;;  %1271 = vmatpush3.bf16.msra.mxu0 %v1268_v27  ;;  %v421_v52 = vld [vmem:[#allocation7 + $0x50] sm:$0xff]  ;;  %v1262_v57 = vpack.c.bf16 %v104_v55, %v101_v54  ;;  %v424_v59 = vld [vmem:[#allocation7 + $0x68] sm:$0xff]  ;;  %v426_v62 = vld [vmem:[#allocation7 + $0x78] sm:$0xff] }
  0x68   :  { %1273 = vmatprep.subr.bf16.mxu0 %v1272_v36  ;;  %v1284_v56 = vpack.c.bf16 %v422_v53, %v421_v52  ;;  %v1288_v60 = vpack.c.bf16 %v424_v59, %v423_v58  ;;  %v425_v61 = vld [vmem:[#allocation7 + $0x70] sm:$0xff]  ;;  %v854_v42 = vld [vmem:[#allocation10] sm:$0xff]  ;;  %v857_v46 = vld [vmem:[#allocation10 + $0x18] sm:$0xff] }
  0x69   :  { %v1292_v63 = vpack.c.bf16 %v426_v62, %v425_v61  ;;  %v858_v48 = vld [vmem:[#allocation10 + $0x20] sm:$0xff]  ;;  %v861_v52 = vld [vmem:[#allocation10 + $0x38] sm:$0xff]  ;;  %v863_v54 = vld [vmem:[#allocation10 + $0x48] sm:$0xff] }
  0x6a   :  { %1249 = vmatpush3.bf16.msra.mxu1 %v1248_v28  ;;  %v866_v59 = vld [vmem:[#allocation10 + $0x60] sm:$0xff]  ;;  %v868_v62 = vld [vmem:[#allocation10 + $0x70] sm:$0xff] }
  0x6b   :  { %1251 = vmatprep.subr.bf16.mxu1 %v1250_v31  ;;  %1275 = vmatpush3.bf16.msra.mxu0 %v1272_v36 }
  0x6c   :  { %1277 = vmatprep.subr.bf16.mxu0 %v1276_v43 }
  0x6d   :  { %1089 = vmatmul.mubr.msk.f32.vlgmr.msra.gmra.mrb[2].mxu1 %vm120_vm0, %v106_v15 }
  0x6e   :  { %1253 = vmatpush1.bf16.msra.mxu1 %v1252_v37  ;;  %332 = vmatprep.mubr.f32.mxu1 %v1515_v0 }
  0x6f   :  { %1255 = vmatprep.subr.bf16.mxu1 %v1254_v40  ;;  %1279 = vmatpush3.bf16.msra.mxu0 %v1276_v43  ;;  %v855_v43 = vld [vmem:[#allocation10 + $0x8] sm:$0xff] }
  0x70   :  { %1281 = vmatprep.subr.bf16.mxu0 %v1280_v49  ;;  %v1321_v45 = vpack.c.bf16 %v855_v43, %v854_v42 }
  0x72   :  { %1257 = vmatpush1.bf16.msra.mxu1 %v1256_v44  ;;  %v856_v44 = vld [vmem:[#allocation10 + $0x10] sm:$0xff] }
  0x73   :  { %1258 = vmatprep.subr.bf16.mxu1 %v1516_v20  ;;  %1283 = vmatpush3.bf16.msra.mxu0 %v1280_v49  ;;  %v1324_v47 = vpack.c.bf16 %v857_v46, %v856_v44  ;;  %v859_v49 = vld [vmem:[#allocation10 + $0x28] sm:$0xff] }
  0x74   :  { %1285 = vmatprep.subr.bf16.mxu0 %v1284_v56  ;;  %v765_v46 = vld [vmem:[#allocation8 + $0x68] sm:$0xff] }
  0x75   :  { %980 = vmatmul.mubr.msk.f32.vlgmr.msra.gmra.mrb[0].mxu1 %vm120_vm0, %v92_v50 }
  0x76   :  { %1260 = vmatpush3.bf16.msra.mxu1 %v1259_v51  ;;  %1099 = vmatprep.mubr.msk.f32.mxu1 %vm1517_vm1, %v1515_v0  ;;  %v860_v51 = vld [vmem:[#allocation10 + $0x30] sm:$0xff] }
  0x77   :  { %1261 = vmatprep.subr.bf16.mxu1 %v1516_v20  ;;  %1287 = vmatpush3.bf16.msra.mxu0 %v1284_v56  ;;  %v1330_v53 = vpack.c.bf16 %v861_v52, %v860_v51  ;;  %v864_v56 = vld [vmem:[#allocation10 + $0x50] sm:$0xff] }
  0x78   :  { %1289 = vmatprep.subr.bf16.mxu0 %v1288_v60 }
  0x7a   :  { %1263 = vmatpush3.bf16.msra.mxu1 %v1262_v57  ;;  %v865_v57 = vld [vmem:[#allocation10 + $0x58] sm:$0xff] }
  0x7b   :  { %1291 = vmatpush3.bf16.msra.mxu0 %v1288_v60  ;;  %v1336_v58 = vpack.c.bf16 %v865_v57, %v864_v56  ;;  %v867_v60 = vld [vmem:[#allocation10 + $0x68] sm:$0xff] }
  0x7c   :  { %1293 = vmatprep.subr.bf16.mxu0 %v1292_v63  ;;  %v1339_v61 = vpack.c.bf16 %v867_v60, %v866_v59  ;;  %v998_v59 = vld [vmem:[%s1705_s5] ss:$0 sm:$0xff]  ;;  %s1476_s5 = scalar_lea.vmem %s965_s12, 256 }
  0x7d   :  { %1100 = vmatmul.mubr.msk.f32.vlgmr.msra.gmra.mrb[2].mxu1 %vm120_vm0, %v92_v50  ;;  %v1327_v50 = vpack.c.bf16 %v859_v49, %v858_v48  ;;  %p1477_p12 = scmp.ne.s32.totalorder %s965_s12, %s1476_s5  ;;  %p1482_p0 = scmp.lt.s32.totalorder %s1476_s5, %s1476_s5 }
  0x7f   :  { %1295 = vmatpush3.bf16.msra.mxu0 %v1292_v63  ;;  %v869_v63 = vld [vmem:[#allocation10 + $0x78] sm:$0xff]  ;;  %p1483_p1 = por %p1482_p0, %p1481_p13 }
  0x80   :  { %1320 = vmatprep.subr.bf16.mxu0 %v1516_v20 }
  0x81   :  { %p1484_p2 = pnand %p1483_p1, %p1477_p12 }
 0x148   :  { %v1642_v1 = vpop.f32.mrb[0].mxu1 }
 0x149   :  { %v336_v2 = vpop.f32.mrb[1].mxu1 }
 0x14a   :  { %v409_v3 = vmul.f32 %v336_v2, %v336_v2  ;;  %1134 = vmatprep.mubr.f32.mxu0 %v336_v2 }
 0x14c   :  { %1135 = vmatmul.mubr.f32.vlgmr.msra.gmra.mrb[0].mxu0 %v409_v3  ;;  %v753_v3 = vld [vmem:[#allocation8 + $0x8] sm:$0xff] }
 0x14d   :  { %1322 = vmatpush3.bf16.msra.mxu0 %v1321_v45 }
 0x14e   :  { %1323 = vmatprep.subr.bf16.mxu0 %v1516_v20 }
 0x150   :  { %v405_v4 = vpop.f32.mrb[2].mxu1 }
 0x151   :  { %v410_v5 = vmul.f32 %v405_v4, %v405_v4  ;;  %v1101_v6 = vpop.f32.mrb[3].mxu1  ;;  %1137 = vmatprep.mubr.f32.mxu0 %v405_v4  ;;  %1325 = vmatpush3.bf16.msra.mxu0 %v1324_v47  ;;  %v764_v47 = vld [vmem:[#allocation8 + $0x60] sm:$0xff] }
 0x152   :  { %1326 = vmatprep.subr.bf16.mxu0 %v1516_v20 }
 0x153   :  { %1138 = vmatmul.mubr.f32.gmra.mrb[2].mxu0 %v410_v5 }
 0x154   :  { %1233 = vmatprep.mubr.msk.f32.mxu0 %vm1517_vm1, %v1515_v0 }
 0x155   :  { %1328 = vmatpush3.bf16.msra.mxu0 %v1327_v50 }
 0x156   :  { %1329 = vmatprep.subr.bf16.mxu0 %v1516_v20 }
 0x159   :  { %1331 = vmatpush3.bf16.msra.mxu0 %v1330_v53  ;;  %v767_v53 = vld [vmem:[#allocation8 + $0x78] sm:$0xff] }
 0x15a   :  { %1332 = vmatprep.subr.bf16.mxu0 %v1516_v20 }
 0x21f   :  { %v1136_v7 = vpop.f32.mrb[0].mxu0 }
 0x220   :  { %v493_v8 = vpop.f32.mrb[1].mxu0 }
 0x221   :  { %v512_v9 = vmul.f32 %v493_v8, %v493_v8  ;;  %v518_v10 = vsub.f32 %v336_v2, %v493_v8  ;;  %v1342_v2 = vpack.c.bf16 %v869_v63, %v868_v62 }
 0x223   :  { %v513_v11 = vsub.f32 %v1136_v7, %v512_v9 }
 0x225   :  { %v514_v12 = vmax.f32 %v513_v11, 0.0  ;;  %v754_v11 = vld [vmem:[#allocation8 + $0x10] sm:$0xff] }
 0x226   :  { %v1139_v13 = vpop.f32.mrb[2].mxu0 }
 0x227   :  { %v519_v14 = vadd.f32 1e-05, %v514_v12  ;;  %v503_v15 = vpop.f32.mrb[3].mxu0 }
 0x228   :  { %v515_v16 = vmul.f32 %v503_v15, %v503_v15  ;;  %v522_v17 = vsub.f32 %v405_v4, %v503_v15  ;;  %v752_v4 = vld [vmem:[#allocation8] sm:$0xff] }
 0x229   :  { %1362 = vrsqrt.f32 %v519_v14 }
 0x22a   :  { %v516_v18 = vsub.f32 %v1139_v13, %v515_v16 }
 0x22c   :  { %v517_v19 = vmax.f32 %v516_v18, 0.0  ;;  %v756_v18 = vld [vmem:[#allocation8 + $0x20] sm:$0xff] }
 0x22e   :  { %v523_v21 = vadd.f32 1e-05, %v517_v19 }
 0x230   :  { %1364 = vrsqrt.f32 %v523_v21 }
 0x233   :  { %v1363_v22 = vpop.eup %1362 }
 0x234   :  { %v521_v23 = vmul.f32 %v1363_v22, %v518_v10  ;;  %v755_v10 = vld [vmem:[#allocation8 + $0x18] sm:$0xff] }
 0x236   :  { %526 = vxpose.xlu0.b32.start.end [1/1] (short) %v521_v23, 128 }
 0x23a   :  { %v1365_v24 = vpop.eup %1364 }
 0x23b   :  { %v525_v25 = vmul.f32 %v1365_v24, %v522_v17  ;;  %v757_v17 = vld [vmem:[#allocation8 + $0x28] sm:$0xff] }
 0x23d   :  { %1140 = vmatprep.subr.mxu1 %v525_v25 }
 0x23e   :  { %1141 = vmatpush3.msra.mxu1 %v525_v25  ;;  %v759_v25 = vld [vmem:[#allocation8 + $0x38] sm:$0xff] }
 0x23f   :  { %1296 = vmatprep.subr.bf16.mxu1 %v1516_v20 }
 0x29b   :  { %949 = vrot.lane.b32.xlu0 %v998_v59, %s1518_s10 }
 0x2b6   :  { %v542_v26 = vpop.trf.xlu0 }
 0x2b7   :  { %1142 = vmatprep.mubr.msk.f32.mxu1 %vm558_vm2, %v542_v26  ;;  %v758_v26 = vld [vmem:[#allocation8 + $0x30] sm:$0xff] }
 0x2ba   :  { %v543_v27 = vpop.trf.xlu0 }
 0x2bb   :  { %1143 = vmatmul.mubr.msk.f32.vlgmr.msra.gmra.mrb[4].mxu1 %vm558_vm2, %v543_v27 }
 0x2be   :  { %v544_v28 = vpop.trf.xlu0 }
 0x2bf   :  { %1145 = vmatprep.mubr.msk.f32.mxu1 %vm558_vm2, %v544_v28 }
 0x2c2   :  { %v545_v29 = vpop.trf.xlu0 }
 0x2c3   :  { %1146 = vmatmul.mubr.msk.f32.gmra.mrb[6].mxu1 %vm558_vm2, %v545_v29 }
 0x2c6   :  { %v546_v30 = vpop.trf.xlu0 }
 0x2c7   :  { %1148 = vmatprep.mubr.msk.f32.mxu1 %vm558_vm2, %v546_v30 }
 0x2ca   :  { %v547_v31 = vpop.trf.xlu0 }
 0x2cb   :  { %1149 = vmatmul.mubr.msk.f32.gmra.mrb[8].mxu1 %vm558_vm2, %v547_v31 }
 0x2ce   :  { %v548_v32 = vpop.trf.xlu0 }
 0x2cf   :  { %1151 = vmatprep.mubr.msk.f32.mxu1 %vm558_vm2, %v548_v32  ;;  %v761_v32 = vld [vmem:[#allocation8 + $0x48] sm:$0xff] }
 0x2d2   :  { %v549_v33 = vpop.trf.xlu0 }
 0x2d3   :  { %1152 = vmatmul.mubr.msk.f32.gmra.mrb[10].mxu1 %vm558_vm2, %v549_v33  ;;  %v760_v33 = vld [vmem:[#allocation8 + $0x40] sm:$0xff] }
 0x2d6   :  { %v550_v34 = vpop.trf.xlu0 }
 0x2d7   :  { %1154 = vmatprep.mubr.msk.f32.mxu1 %vm558_vm2, %v550_v34 }
 0x2da   :  { %v551_v35 = vpop.trf.xlu0 }
 0x2db   :  { %1155 = vmatmul.mubr.msk.f32.gmra.mrb[12].mxu1 %vm558_vm2, %v551_v35 }
 0x2de   :  { %v552_v36 = vpop.trf.xlu0 }
 0x2df   :  { %1157 = vmatprep.mubr.msk.f32.mxu1 %vm558_vm2, %v552_v36 }
 0x2e2   :  { %v553_v37 = vpop.trf.xlu0 }
 0x2e3   :  { %1158 = vmatmul.mubr.msk.f32.gmra.mrb[14].mxu1 %vm558_vm2, %v553_v37 }
 0x2e6   :  { %v554_v38 = vpop.trf.xlu0 }
 0x2e7   :  { %1160 = vmatprep.mubr.msk.f32.mxu1 %vm558_vm2, %v554_v38 }
 0x2ea   :  { %v555_v39 = vpop.trf.xlu0 }
 0x2eb   :  { %1161 = vmatmul.mubr.msk.f32.gmra.mrb[16].mxu1 %vm558_vm2, %v555_v39  ;;  %v763_v39 = vld [vmem:[#allocation8 + $0x58] sm:$0xff] }
 0x2ee   :  { %v556_v40 = vpop.trf.xlu0 }
 0x2ef   :  { %1163 = vmatprep.mubr.msk.f32.mxu1 %vm558_vm2, %v556_v40  ;;  %v762_v40 = vld [vmem:[#allocation8 + $0x50] sm:$0xff] }
 0x2f2   :  { %v557_v41 = vpop.trf.xlu0 }
 0x2f3   :  { %1164 = vmatmul.mubr.msk.f32.gmra.mrb[18].mxu1 %vm558_vm2, %v557_v41 }
 0x2f4   :  { %1198 = vmatprep.mubr.msk.f32.mxu1 %vm1517_vm1, %v1515_v0  ;;  %v862_v0 = vld [vmem:[#allocation10 + $0x40] sm:$0xff] }
 0x2f5   :  { %v1333_v55 = vpack.c.bf16 %v863_v54, %v862_v0  ;;  %v766_v0 = vld [vmem:[#allocation8 + $0x70] sm:$0xff] }
 0x2f7   :  { %1334 = vmatpush3.bf16.msra.mxu0 %v1333_v55 }
 0x2f8   :  { %1335 = vmatprep.subr.bf16.mxu0 %v1516_v20 }
 0x2fb   :  { %1337 = vmatpush3.bf16.msra.mxu0 %v1336_v58 }
 0x2fc   :  { %1338 = vmatprep.subr.bf16.mxu0 %v1516_v20 }
 0x2ff   :  { %1340 = vmatpush3.bf16.msra.mxu0 %v1339_v61 }
 0x300   :  { %1341 = vmatprep.subr.bf16.mxu0 %v1516_v20 }
 0x303   :  { %1343 = vmatpush3.bf16.msra.mxu0 %v1342_v2 }
 0x30d   :  { %v950_v62 = vpop.permute.xlu0 %949 }
 0x38e   :  { %v1144_v5 = vpop.f32.mrb[4].mxu1 }
 0x38f   :  { %v769_v6 = vmul.f32 %v1144_v5, %v753_v3  ;;  %v673_v7 = vpop.f32.mrb[5].mxu1 }
 0x390   :  { %v768_v8 = vmul.f32 %v752_v4, %v673_v7 }
 0x392   :  { %v1297_v9 = vpack.c.bf16 %v769_v6, %v768_v8 }
 0x394   :  { %1298 = vmatpush3.bf16.msra.mxu1 %v1297_v9 }
 0x395   :  { %1299 = vmatprep.subr.bf16.mxu1 %v1516_v20 }
 0x396   :  { %v1147_v12 = vpop.f32.mrb[6].mxu1 }
 0x397   :  { %v771_v13 = vmul.f32 %v1147_v12, %v755_v10  ;;  %v683_v14 = vpop.f32.mrb[7].mxu1 }
 0x398   :  { %v770_v15 = vmul.f32 %v754_v11, %v683_v14 }
 0x39a   :  { %v1300_v16 = vpack.c.bf16 %v771_v13, %v770_v15 }
 0x39c   :  { %1301 = vmatpush3.bf16.msra.mxu1 %v1300_v16 }
 0x39d   :  { %1302 = vmatprep.subr.bf16.mxu1 %v1516_v20 }
 0x39e   :  { %v1150_v19 = vpop.f32.mrb[8].mxu1 }
 0x39f   :  { %v773_v21 = vmul.f32 %v1150_v19, %v757_v17  ;;  %v693_v22 = vpop.f32.mrb[9].mxu1 }
 0x3a0   :  { %v772_v23 = vmul.f32 %v756_v18, %v693_v22 }
 0x3a2   :  { %v1303_v24 = vpack.c.bf16 %v773_v21, %v772_v23 }
 0x3a4   :  { %1304 = vmatpush3.bf16.msra.mxu1 %v1303_v24 }
 0x3a5   :  { %1305 = vmatprep.subr.bf16.mxu1 %v1516_v20 }
 0x3a6   :  { %v1153_v27 = vpop.f32.mrb[10].mxu1 }
 0x3a7   :  { %v775_v28 = vmul.f32 %v1153_v27, %v759_v25  ;;  %v703_v29 = vpop.f32.mrb[11].mxu1 }
 0x3a8   :  { %v774_v30 = vmul.f32 %v758_v26, %v703_v29 }
 0x3aa   :  { %v1306_v31 = vpack.c.bf16 %v775_v28, %v774_v30 }
 0x3ac   :  { %1307 = vmatpush3.bf16.msra.mxu1 %v1306_v31 }
 0x3ad   :  { %1308 = vmatprep.subr.bf16.mxu1 %v1516_v20 }
 0x3ae   :  { %v1156_v34 = vpop.f32.mrb[12].mxu1 }
 0x3af   :  { %v777_v35 = vmul.f32 %v1156_v34, %v761_v32  ;;  %v713_v36 = vpop.f32.mrb[13].mxu1 }
 0x3b0   :  { %v776_v37 = vmul.f32 %v760_v33, %v713_v36 }
 0x3b2   :  { %v1309_v38 = vpack.c.bf16 %v777_v35, %v776_v37 }
 0x3b4   :  { %1310 = vmatpush3.bf16.msra.mxu1 %v1309_v38 }
 0x3b5   :  { %1311 = vmatprep.subr.bf16.mxu1 %v1516_v20 }
 0x3b6   :  { %v1159_v41 = vpop.f32.mrb[14].mxu1 }
 0x3b7   :  { %v779_v42 = vmul.f32 %v1159_v41, %v763_v39  ;;  %v723_v43 = vpop.f32.mrb[15].mxu1 }
 0x3b8   :  { %v778_v44 = vmul.f32 %v762_v40, %v723_v43 }
 0x3ba   :  { %v1312_v45 = vpack.c.bf16 %v779_v42, %v778_v44 }
 0x3bc   :  { %1313 = vmatpush3.bf16.msra.mxu1 %v1312_v45 }
 0x3bd   :  { %1314 = vmatprep.subr.bf16.mxu1 %v1516_v20 }
 0x3be   :  { %v1162_v48 = vpop.f32.mrb[16].mxu1 }
 0x3bf   :  { %v781_v49 = vmul.f32 %v1162_v48, %v765_v46  ;;  %v733_v50 = vpop.f32.mrb[17].mxu1 }
 0x3c0   :  { %v780_v51 = vmul.f32 %v764_v47, %v733_v50 }
 0x3c2   :  { %v1315_v52 = vpack.c.bf16 %v781_v49, %v780_v51 }
 0x3c4   :  { %1316 = vmatpush3.bf16.msra.mxu1 %v1315_v52 }
 0x3c5   :  { %1317 = vmatprep.subr.bf16.mxu1 %v1516_v20 }
 0x3c6   :  { %v1165_v54 = vpop.f32.mrb[18].mxu1 }
 0x3c7   :  { %v783_v55 = vmul.f32 %v1165_v54, %v767_v53  ;;  %v743_v56 = vpop.f32.mrb[19].mxu1 }
 0x3c8   :  { %v782_v57 = vmul.f32 %v766_v0, %v743_v56 }
 0x3ca   :  { %v1318_v58 = vpack.c.bf16 %v783_v55, %v782_v57 }
 0x3cc   :  { %1319 = vmatpush3.bf16.msra.mxu1 %v1318_v58 }
 0x3cf   :  { %1199 = vmatmul.mubr.f32.vlgmr.msra.gmra.mrb[20].mxu1 %v1642_v1 }
 0x4a2   :  { %v850_v60 = vpop.f32.mrb[20].mxu1 }
 0x4a3   :  { %v1200_v61 = vpop.f32.mrb[21].mxu1  ;;  %1234 = vmatmul.mubr.f32.vlgmr.msra.gmra.mrb[4].mxu0 %v850_v60 }
 0x576   :  { %v936_v63 = vpop.f32.mrb[4].mxu0 }
 0x577   :  { %v947_v20 = vadd.f32 %v998_v59, %v936_v63  ;;  %v1235_v2 = vpop.f32.mrb[5].mxu0  ;;  %v952_v3 = vadd.f32 %v950_v62, %v936_v63 }
 0x579   :  { %948 = vst.msk [vmem:[#allocation11] sm:$0xff] %vm120_vm0, %v947_v20  ;;  %954 = vrot.lane.b32.xlu1 %v952_v3, %s1518_s10 }
 0x5eb   :  { %v955_v1 = vpop.permute.xlu1 %954 }
 0x5ec   :  { %958 = vst.msk [vmem:[#allocation11 + $0x8] sm:$0xff] %vm120_vm0, %v955_v1 }
 0x5ed   :  { %1487 = shalt.err (!%p1484_p2)
}
 0x5ee   :  { %s1488_s16 = scalar_lea.hbm %s1706_s6, 256 }
 0x5ef   :  { %p1489_p3 = scmp.ne.s32.totalorder %s1706_s6, %s1488_s16  ;;  %p1492_p4 = scmp.lt.u32.totalorder %s1488_s16, %s1706_s6 }
 0x5f1   :  { %p1494_p5 = pnand %p1492_p4, %p1489_p3 }
 0x5f3   :  { %1497 = shalt.err (!%p1494_p5)
}
 0x5f4   :  { %970 = dma.vmem_to_hbm [thread:$0]  %s965_s12, 256, %s1706_s6, [#allocation4], %s1511_s22, %s1511_s22, %s1512_s23  }
 0x5f5   :  { %1504 = dma.done.wait [#allocation4], 256  }
 0x5f6   :  { %1505 = vsyncadd [#allocation4], 4294967040 }
 0x5f7   :  { %974 = vsyncpa [#allocation3], 1 }
 0x5f8   :  { %975 = vsyncpa [#allocation6], 1 }
 0x5f9   :  { %976 = vsyncpa [#allocation9], 1 }
 0x5fa   :  { %977 = vsyncpa [#allocation4], 1 }

</bundles_post_ra>
